<compile_context>
chip_gen: v6e
topology: v6e:2x2x1
jax: 0.10.0
libtpu: 0.0.40
codegen_flags: <defaults>
</compile_context>

<pallas_src>
import functools
import math

import jax
import jax.numpy as jnp
from jax.experimental import pallas as pl
from jax.experimental.pallas import tpu as pltpu

LANES = 128
MAX_BLOCK_ROWS = 4096            # 4096x128 f32 = 2 MiB; x2 inputs x2 buffers = 8 MiB VMEM
VMEM_LIMIT_BYTES = 32 * 1024 * 1024
EXP = 1.0 / 3.0
_SIGN_BIT = -(1 << 31)           # 0x80000000 as int32


def _cdiv(a, b):
    return -(-a // b)


def _round_up(a, m):
    return _cdiv(a, m) * m


def _detect_two_tensorcores():
    # v7x exposes 2 TensorCores per device; v5e/v6e have a single TC, where a
    # 2-way "parallel" split is pure overhead (serial grid loop + mask work).
    try:
        kind = jax.devices()[0].device_kind.lower()
    except Exception:
        return False
    return ("v7" in kind) or ("7x" in kind)


_TWO_CORES = _detect_two_tensorcores()


def _signed_cbrt_kernel(x):
    """sign(x) * |x|**(1/3), sign re-attached via a copysign bit-OR."""
    # TODO(synk): on v7x (EUP-bound regime) replace pow -> exp/log (2 EUP
    # ops/elem) with a bit-hack inverse-cbrt seed + division-free Newton
    # refinement on the VPU to cut transcendental count.
    mag = jnp.power(jnp.abs(x), EXP)                       # >= 0, sign bit clear
    sign_bits = jnp.bitwise_and(pltpu.bitcast(x, jnp.int32),
                                jnp.int32(_SIGN_BIT))
    return pltpu.bitcast(
        jnp.bitwise_or(pltpu.bitcast(mag, jnp.int32), sign_bits), jnp.float32)


def _signed_cbrt_xla(x):
    return jnp.sign(x) * jnp.power(jnp.abs(x), EXP)


def _loss_kernel(r_ref, o_ref, out_ref, *, block_rows, valid_rows,
                 blocks_per_split, num_full_blocks, needs_mask):
    c = pl.program_id(0)          # "parallel" split axis
    i = pl.program_id(1)          # reduction ("arbitrary") axis

    @pl.when(i == 0)
    def _():
        out_ref[...] = jnp.zeros_like(out_ref)

    r = r_ref[...].astype(jnp.float32)
    o = o_ref[...].astype(jnp.float32)
    d = _signed_cbrt_kernel(r) - _signed_cbrt_kernel(o)
    dsq = d * d

    def _accumulate(x):
        # Tile-aligned fold down to one (8, 128) vreg: pure VPU adds, no
        # per-block cross-sublane (XLU) reduce, aligned (8,128) RMW store.
        out_ref[...] += x.reshape(-1, 8, LANES).sum(axis=0)

    if not needs_mask:
        _accumulate(dsq)
    else:
        gb = c * blocks_per_split + i          # global (unclamped) block index

        @pl.when(gb < num_full_blocks)
        def _():                               # steady state: no mask cost
            _accumulate(dsq)

        @pl.when(gb >= num_full_blocks)
        def _():                               # partial edge / overflow block
            row_idx = gb * block_rows + jax.lax.broadcasted_iota(
                jnp.int32, (block_rows, 1), 0)
            # select (not multiply) so NaN garbage from invalid rows is killed
            _accumulate(jnp.where(row_idx < valid_rows, dsq, 0.0))


def _partial_sums(r2, o2, rows):
    """Pallas reduction over a (rows, 128) pair -> (num_splits*8, 128) partials."""
    block_rows = min(MAX_BLOCK_ROWS, _round_up(rows, 8))
    num_blocks = _cdiv(rows, block_rows)

    # 2-way core split only on 2-TC chips, and only when it does not create a
    # wasteful clamp-overflow iteration on small block counts.
    num_splits = 1
    if _TWO_CORES and num_blocks >= 2 and (num_blocks % 2 == 0 or num_blocks >= 8):
        num_splits = 2
    blocks_per_split = _cdiv(num_blocks, num_splits)

    num_full_blocks = rows // block_rows            # blocks with no invalid rows
    needs_mask = num_splits * blocks_per_split > num_full_blocks

    def in_map(c, i):
        # Clamp so overflow iterations (odd block counts under the 2-way split)
        # re-read the last in-bounds block; their contribution is masked to 0.
        return (jnp.minimum(c * blocks_per_split + i, num_blocks - 1), 0)

    kernel = functools.partial(
        _loss_kernel, block_rows=block_rows, valid_rows=rows,
        blocks_per_split=blocks_per_split, num_full_blocks=num_full_blocks,
        needs_mask=needs_mask)

    # TODO(synk): on v7x verify the leading "parallel" axis actually shards
    # across both TensorCores; if not, switch that axis to pltpu.CORE_PARALLEL.
    return pl.pallas_call(
        kernel,
        out_shape=jax.ShapeDtypeStruct((num_splits * 8, LANES), jnp.float32),
        grid_spec=pltpu.PrefetchScalarGridSpec(
            num_scalar_prefetch=0,
            grid=(num_splits, blocks_per_split),
            in_specs=[
                pl.BlockSpec((block_rows, LANES), in_map),
                pl.BlockSpec((block_rows, LANES), in_map),
            ],
            out_specs=pl.BlockSpec((8, LANES), lambda c, i: (c, 0)),
        ),
        compiler_params=pltpu.CompilerParams(
            dimension_semantics=("parallel", "arbitrary"),
            vmem_limit_bytes=VMEM_LIMIT_BYTES),
    )(r2, o2)


@jax.jit
def enlarge_reconstruction_loss(reconstructed, origin):
    assert reconstructed.shape == origin.shape, (
        f"reconstructed.shape({reconstructed.shape}) should be equal to "
        f"origin.shape({origin.shape})"
    )
    n_elems = math.prod(reconstructed.shape)

    # Native dtype, contiguous reshape only (no pad, no wrapper cast).
    r_flat = reconstructed.reshape(-1)
    o_flat = origin.reshape(-1)

    rows = n_elems // LANES
    main = rows * LANES

    total = jnp.zeros((), jnp.float32)
    if rows > 0:
        partials = _partial_sums(
            r_flat[:main].reshape(rows, LANES),
            o_flat[:main].reshape(rows, LANES),
            rows,
        )
        total = total + jnp.sum(partials)
    if main < n_elems:
        # Ragged tail (< 128 elements): plain XLA — avoids padding/rewriting
        # the full arrays in HBM just for a few elements.
        rt = r_flat[main:].astype(jnp.float32)
        ot = o_flat[main:].astype(jnp.float32)
        total = total + jnp.sum((_signed_cbrt_xla(rt) - _signed_cbrt_xla(ot)) ** 2)

    # n_elems is a static Python int -> no int32 overflow, no in-kernel divide.
    # NOTE: per-lane f32 sequential accumulation is fine at these sizes; for
    # 1e9+ element tensors consider a second-level pairwise combine.
    return total / float(n_elems)


def _reference(reconstructed, origin):
    r = jnp.sign(reconstructed) * jnp.abs(reconstructed) ** EXP
    o = jnp.sign(origin) * jnp.abs(origin) ** EXP
    return jnp.mean((r - o) ** 2)


if __name__ == "__main__":
    key = jax.random.PRNGKey(0)

    shapes = [
        (2, 4, 16, 16),    # primary NCHW shape: single small block, no mask
        (2, 8, 96, 96),    # one large 1152-row block, no mask
        (2, 4, 300, 300),  # multi-block: masked partial edge block
        (1, 3, 37, 41),    # unaligned: masked single block + ragged XLA tail
    ]
    for idx, shape in enumerate(shapes):
        k1, k2 = jax.random.split(jax.random.fold_in(key, idx))
        reconstructed = jax.random.normal(k1, shape, dtype=jnp.float32)
        origin = jax.random.normal(k2, shape, dtype=jnp.float32)

        loss = jax.block_until_ready(
            enlarge_reconstruction_loss(reconstructed, origin))
        ref = _reference(reconstructed, origin)
        assert jnp.allclose(loss, ref, rtol=1e-4, atol=1e-5), (shape, loss, ref)

    print("KERNEL_OK")
</pallas_src>

<mosaic_0001>
module attributes {stable_mosaic.version = 11 : i64} {
  func.func @_loss_kernel(%arg0: i32, %arg1: i32, %arg2: memref<16x128xf32, #tpu.memory_space<vmem>>, %arg3: memref<16x128xf32, #tpu.memory_space<vmem>>, %arg4: memref<8x128xf32, #tpu.memory_space<vmem>>) attributes {dimension_semantics = [#tpu.dimension_semantics<parallel>, #tpu.dimension_semantics<arbitrary>], iteration_bounds = array<i64: 1, 1>, scalar_prefetch = 0 : i64, scratch_operands = 0 : i64, tpu.core_type = #tpu.core_type<tc>, window_params = [{transform_indices = @transform_0, window_bounds = array<i64: 16, 128>}, {transform_indices = @transform_1, window_bounds = array<i64: 16, 128>}, {transform_indices = @transform_2, window_bounds = array<i64: 8, 128>}]} {
    %c0_i32 = arith.constant 0 : i32
    %0 = arith.cmpi eq, %arg1, %c0_i32 : i32
    %1 = arith.extui %0 : i1 to i32
    %c0_i32_0 = arith.constant 0 : i32
    %2 = arith.cmpi ne, %1, %c0_i32_0 : i32
    scf.if %2 {
      %cst_11 = arith.constant 0.000000e+00 : f32
      %30 = vector.broadcast %cst_11 : f32 to vector<8x128xf32>
      %c0_12 = arith.constant 0 : index
      %c0_13 = arith.constant 0 : index
      %31 = vector.load %arg4[%c0_12, %c0_13] : memref<8x128xf32, #tpu.memory_space<vmem>>, vector<8x128xf32>
      tpu.vector_store %arg4[%c0_12, %c0_13], %30 {strides = array<i32>} : memref<8x128xf32, #tpu.memory_space<vmem>>, vector<8x128xf32>,
    } else {
    }
    %c0 = arith.constant 0 : index
    %c0_1 = arith.constant 0 : index
    %3 = vector.load %arg2[%c0, %c0_1] : memref<16x128xf32, #tpu.memory_space<vmem>>, vector<16x128xf32>
    %c0_2 = arith.constant 0 : index
    %c0_3 = arith.constant 0 : index
    %4 = vector.load %arg3[%c0_2, %c0_3] : memref<16x128xf32, #tpu.memory_space<vmem>>, vector<16x128xf32>
    %5 = math.absf %3 : vector<16x128xf32>
    %cst = arith.constant 0.333333343 : f32
    %6 = vector.broadcast %cst : f32 to vector<16x128xf32>
    %7 = math.powf %5, %6 : vector<16x128xf32>
    %8 = tpu.bitcast %3 : vector<16x128xf32> -> vector<16x128xi32>
    %c-2147483648_i32 = arith.constant -2147483648 : i32
    %9 = vector.broadcast %c-2147483648_i32 : i32 to vector<16x128xi32>
    %10 = arith.andi %8, %9 : vector<16x128xi32>
    %11 = tpu.bitcast %7 : vector<16x128xf32> -> vector<16x128xi32>
    %12 = arith.ori %11, %10 : vector<16x128xi32>
    %13 = tpu.bitcast %12 : vector<16x128xi32> -> vector<16x128xf32>
    %14 = math.absf %4 : vector<16x128xf32>
    %cst_4 = arith.constant 0.333333343 : f32
    %15 = vector.broadcast %cst_4 : f32 to vector<16x128xf32>
    %16 = math.powf %14, %15 : vector<16x128xf32>
    %17 = tpu.bitcast %4 : vector<16x128xf32> -> vector<16x128xi32>
    %c-2147483648_i32_5 = arith.constant -2147483648 : i32
    %18 = vector.broadcast %c-2147483648_i32_5 : i32 to vector<16x128xi32>
    %19 = arith.andi %17, %18 : vector<16x128xi32>
    %20 = tpu.bitcast %16 : vector<16x128xf32> -> vector<16x128xi32>
    %21 = arith.ori %20, %19 : vector<16x128xi32>
    %22 = tpu.bitcast %21 : vector<16x128xi32> -> vector<16x128xf32>
    %23 = arith.subf %13, %22 : vector<16x128xf32>
    %24 = arith.mulf %23, %23 : vector<16x128xf32>
    %c0_6 = arith.constant 0 : index
    %c0_7 = arith.constant 0 : index
    %25 = vector.load %arg4[%c0_6, %c0_7] : memref<8x128xf32, #tpu.memory_space<vmem>>, vector<8x128xf32>
    %26 = vector.shape_cast %24 : vector<16x128xf32> to vector<2x8x128xf32>
    %cst_8 = arith.constant dense<0.000000e+00> : vector<8x128xf32>
    %27 = vector.multi_reduction <add>, %26, %cst_8 [0] : vector<2x8x128xf32> to vector<8x128xf32>
    %28 = arith.addf %25, %27 : vector<8x128xf32>
    %c0_9 = arith.constant 0 : index
    %c0_10 = arith.constant 0 : index
    %29 = vector.load %arg4[%c0_9, %c0_10] : memref<8x128xf32, #tpu.memory_space<vmem>>, vector<8x128xf32>
    tpu.vector_store %arg4[%c0_9, %c0_10], %28 {strides = array<i32>} : memref<8x128xf32, #tpu.memory_space<vmem>>, vector<8x128xf32>,
    return
  }
  func.func @transform_0(%arg0: i32, %arg1: i32) -> (i32, i32) {
    %c1_i32 = arith.constant 1 : i32
    %0 = arith.muli %arg0, %c1_i32 : i32
    %1 = arith.addi %0, %arg1 : i32
    %c0_i32 = arith.constant 0 : i32
    %2 = arith.minsi %1, %c0_i32 : i32
    %c0_i32_0 = arith.constant 0 : i32
    %c0_i32_1 = arith.constant 0 : i32
    return %2, %c0_i32_0 : i32, i32
  }
  func.func @transform_1(%arg0: i32, %arg1: i32) -> (i32, i32) {
    %c1_i32 = arith.constant 1 : i32
    %0 = arith.muli %arg0, %c1_i32 : i32
    %1 = arith.addi %0, %arg1 : i32
    %c0_i32 = arith.constant 0 : i32
    %2 = arith.minsi %1, %c0_i32 : i32
    %c0_i32_0 = arith.constant 0 : i32
    %c0_i32_1 = arith.constant 0 : i32
    return %2, %c0_i32_0 : i32, i32
  }
  func.func @transform_2(%arg0: i32, %arg1: i32) -> (i32, i32) {
    %c0_i32 = arith.constant 0 : i32
    %c0_i32_0 = arith.constant 0 : i32
    return %arg0, %c0_i32 : i32, i32
  }
}

</mosaic_0001>

<bundles_post_ra>
// kernel: enlarge_reconstruction_loss.1
= control target key start
LH: loop header
LB: loop body
LE: loop exit
PB: predicated region body
PF: predicated region fallthrough
CT: control target
= control target key end

     0   :  { %s324_s0 = inlined_call_operand.vmem [shape: f32[16,128], index: 0, kind: input, shape index: {}]   ;;  %s325_s1 = inlined_call_operand.vmem [shape: f32[16,128], index: 1, kind: input, shape index: {}]   ;;  %s326_s2 = inlined_call_operand.vmem [shape: f32[8,128], index: 2, kind: output, shape index: {}]  }
   0x1   :  { %v243_v0 = vld [vmem:[%s324_s0] sm:$0xff]  ;;  %v248_v1 = vld [vmem:[%s324_s0 + $0x8] sm:$0xff] }
   0x2   :  { %v253_v2 = vld [vmem:[%s325_s1] sm:$0xff]  ;;  %v258_v3 = vld [vmem:[%s325_s1 + $0x8] sm:$0xff]  ;;  %v84_v4 = vand.u32 2147483647, %v243_v0  ;;  %v262_v5 = vand.u32 2147483647, %v248_v1 }
   0x3   :  { %v265_v6 = vand.u32 2147483647, %v253_v2  ;;  %v268_v7 = vand.u32 2147483647, %v258_v3  ;;  %v90_v18 = vand.u32 2147483648, %v243_v0  ;;  %v91_v19 = vand.u32 2147483648, %v248_v1 }
   0x4   :  { %209 = vlog2.f32 %v84_v4  ;;  %v142_v16 = vand.u32 2147483648, %v84_v4  ;;  %v160_v17 = vand.u32 2147483648, %v262_v5  ;;  %v104_v20 = vand.u32 2147483648, %v253_v2 }
   0x5   :  { %211 = vlog2.f32 %v262_v5  ;;  %vm136_vm0 = vcmp.eq.f32.partialorder %v84_v4, 0.0  ;;  %vm137_vm1 = vcmp.lt.f32.partialorder %v84_v4, 0.0  ;;  %vm146_vm2 = vweird.f32 %v84_v4 }
   0x6   :  { %213 = vlog2.f32 %v265_v6  ;;  %v178_v22 = vand.u32 2147483648, %v265_v6  ;;  %vm139_vm3 = vcmp.eq.f32.partialorder %v84_v4, inf  ;;  %vm154_vm4 = vcmp.eq.f32.partialorder %v262_v5, 0.0 }
   0x7   :  { %215 = vlog2.f32 %v268_v7  ;;  %vm155_vm5 = vcmp.lt.f32.partialorder %v262_v5, 0.0  ;;  %vm157_vm6 = vcmp.eq.f32.partialorder %v262_v5, inf  ;;  %vm164_vm7 = vweird.f32 %v262_v5 }
   0x8   :  { %vm172_vm8 = vcmp.eq.f32.partialorder %v265_v6, 0.0  ;;  %v196_v25 = vand.u32 2147483648, %v268_v7  ;;  %vm173_vm9 = vcmp.lt.f32.partialorder %v265_v6, 0.0  ;;  %vm182_vm10 = vweird.f32 %v265_v6 }
   0x9   :  { %vm175_vm11 = vcmp.eq.f32.partialorder %v265_v6, inf  ;;  %vm190_vm12 = vcmp.eq.f32.partialorder %v268_v7, 0.0  ;;  %vm191_vm13 = vcmp.lt.f32.partialorder %v268_v7, 0.0  ;;  %vm200_vm14 = vweird.f32 %v268_v7 }
   0xa   :  { %vm193_vm15 = vcmp.eq.f32.partialorder %v268_v7, inf  ;;  %v105_v44 = vand.u32 2147483648, %v258_v3 }
  0x11   :  { %v210_v8 = vpop.eup %209 }
  0x12   :  { %v143_v9 = vmul.f32 0.33333334, %v210_v8  ;;  %v212_v10 = vpop.eup %211 }
  0x13   :  { %v214_v11 = vpop.eup %213  ;;  %v161_v12 = vmul.f32 0.33333334, %v212_v10 }
  0x14   :  { %217 = vpow2.f32 %v143_v9  ;;  %v179_v13 = vmul.f32 0.33333334, %v214_v11  ;;  %v216_v14 = vpop.eup %215 }
  0x15   :  { %219 = vpow2.f32 %v161_v12  ;;  %v197_v15 = vmul.f32 0.33333334, %v216_v14 }
  0x16   :  { %221 = vpow2.f32 %v179_v13 }
  0x17   :  { %223 = vpow2.f32 %v197_v15 }
  0x21   :  { %v218_v21 = vpop.eup %217 }
  0x22   :  { %v145_v23 = vor.u32 %v218_v21, %v142_v16  ;;  %v220_v24 = vpop.eup %219 }
  0x23   :  { %v222_v26 = vpop.eup %221  ;;  %v163_v28 = vor.u32 %v220_v24, %v160_v17 }
  0x24   :  { %v147_v27 = vsel %vm146_vm2, %v84_v4, %v145_v23  ;;  %v181_v30 = vor.u32 %v222_v26, %v178_v22  ;;  %v224_v31 = vpop.eup %223 }
  0x25   :  { %v150_v29 = vsel %vm136_vm0, %v142_v16, %v147_v27  ;;  %v165_v33 = vsel %vm164_vm7, %v262_v5, %v163_v28  ;;  %v199_v37 = vor.u32 %v224_v31, %v196_v25 }
  0x26   :  { %v151_v32 = vsel %vm137_vm1, nan, %v150_v29  ;;  %v168_v35 = vsel %vm154_vm4, %v160_v17, %v165_v33  ;;  %v183_v36 = vsel %vm182_vm10, %v265_v6, %v181_v30 }
  0x27   :  { %v152_v34 = vsel %vm136_vm0, 0.0, %v151_v32  ;;  %v169_v39 = vsel %vm155_vm5, nan, %v168_v35  ;;  %v186_v40 = vsel %vm172_vm8, %v178_v22, %v183_v36  ;;  %v201_v43 = vsel %vm200_vm14, %v268_v7, %v199_v37 }
  0x28   :  { %v153_v38 = vsel %vm139_vm3, inf, %v152_v34  ;;  %v170_v41 = vsel %vm154_vm4, 0.0, %v169_v39  ;;  %v187_v42 = vsel %vm173_vm9, nan, %v186_v40  ;;  %v204_v48 = vsel %vm190_vm12, %v196_v25, %v201_v43 }
  0x29   :  { %v171_v45 = vsel %vm157_vm6, inf, %v170_v41  ;;  %v94_v46 = vor.u32 %v153_v38, %v90_v18  ;;  %v188_v47 = vsel %vm172_vm8, 0.0, %v187_v42  ;;  %v205_v50 = vsel %vm191_vm13, nan, %v204_v48 }
  0x2a   :  { %v189_v49 = vsel %vm175_vm11, inf, %v188_v47  ;;  %v95_v51 = vor.u32 %v171_v45, %v91_v19  ;;  %v206_v52 = vsel %vm190_vm12, 0.0, %v205_v50 }
  0x2b   :  { %v108_v53 = vor.u32 %v189_v49, %v104_v20  ;;  %v207_v54 = vsel %vm193_vm15, inf, %v206_v52 }
  0x2c   :  { %v109_v55 = vor.u32 %v207_v54, %v105_v44 }
  0x2d   :  { %v112_v56 = vsub.f32 %v94_v46, %v108_v53 }
  0x2e   :  { %v113_v57 = vsub.f32 %v95_v51, %v109_v55 }
  0x2f   :  { %v114_v58 = vmul.f32 %v112_v56, %v112_v56 }
  0x30   :  { %v115_v59 = vmul.f32 %v113_v57, %v113_v57 }
  0x32   :  { %v117_v60 = vadd.f32 %v115_v59, %v114_v58 }
  0x34   :  { %119 = vst [vmem:[%s326_s2] sm:$0xff] %v117_v60 }

</bundles_post_ra>
